<compile_context>
chip_gen: v7x
topology: tpu7x:2x2x1
jax: 0.10.0
libtpu: 0.0.40
codegen_flags: <defaults>
</compile_context>

<pallas_src>
import jax
import jax.numpy as jnp
import numpy as np
from jax import lax
from jax.experimental import pallas as pl
from jax.experimental.pallas import tpu as pltpu

AGENTS = 4
FEAT = 256           # 16 * 4 * 4
HID1 = 256
HID2 = 128
QUERY_SIZE = 32
KEY_SIZE = 256       # == FEAT
LINK_THRES = 0.25

# Packed-bias lane offsets (all multiples of 128 -> aligned static slices).
B1_OFF, B2_OFF, BQ_OFF, B_TOT = 0, HID1, HID1 + HID2, HID1 + HID2 + KEY_SIZE  # 0,256,384,640

# Packed output slab: (8, 256) f32
#   rows 0..3            : feat_fuse (flattened, per query)
#   rows 4..7, lanes 0..3: prob_action (keys x queries)
#   row  4,   lanes 4..7 : action (argmax over keys, per query) as f32
#   row  4,   lanes 8..11: link_num (per query) as f32
SLAB_ROWS = 8


def mimocom_kernel(x_ref, w1_ref, w2_ref, wq_ref, b_ref, out_ref):
    x = x_ref[...]                                                   # (4, 256) f32

    b1 = b_ref[:, B1_OFF:B2_OFF]                                     # (1, 256)
    b2 = b_ref[:, B2_OFF:BQ_OFF]                                     # (1, 128)
    bq = b_ref[:, BQ_OFF:B_TOT]                                      # (1, 256)

    # --- km_generator MLP (bf16 weights, f32 accumulation) ---
    h1 = jnp.maximum(
        jnp.dot(x.astype(jnp.bfloat16), w1_ref[...],
                preferred_element_type=jnp.float32) + b1, 0.0)       # (4, 256)
    h2 = jnp.maximum(
        jnp.dot(h1.astype(jnp.bfloat16), w2_ref[...],
                preferred_element_type=jnp.float32) + b2, 0.0)       # (4, 128)

    # --- fused fc3 (128->32) + attention Linear (32->256) ---
    query = jnp.dot(h2.astype(jnp.bfloat16), wq_ref[...],
                    preferred_element_type=jnp.float32) + bq         # (4, 256)

    # --- attn[k, q] = key[k] . query[q]  (key_mat == raw inputs), f32 path ---
    attn = lax.dot_general(x, query, (((1,), (1,)), ((), ())),
                           preferred_element_type=jnp.float32)       # (keys, queries)

    # --- softmax over keys (torch dim=1 of (1, K, Q)); exact division ---
    m = jnp.max(attn, axis=0, keepdims=True)
    e = jnp.exp(attn - m)
    soft = e / jnp.sum(e, axis=0, keepdims=True)                     # (4, 4)

    # --- feat_fuse (flattened values): feat[q, :] = sum_k soft[k, q] * x[k, :] ---
    feat = lax.dot_general(soft, x, (((0,), (0,)), ((), ())),
                           preferred_element_type=jnp.float32)       # (4, 256)

    # --- prob_action = softmax + 0.001 * I ---
    r = lax.broadcasted_iota(jnp.int32, (AGENTS, AGENTS), 0)
    c = lax.broadcasted_iota(jnp.int32, (AGENTS, AGENTS), 1)
    eye = r == c
    prob = soft + jnp.where(eye, jnp.float32(0.001), jnp.float32(0.0))

    # action = argmax over keys (first maximal index)
    col_max = jnp.max(prob, axis=0, keepdims=True)
    first_idx = jnp.min(
        jnp.where(prob == col_max, r.astype(jnp.float32), jnp.float32(AGENTS)),
        axis=0, keepdims=True)                                       # (1, 4) f32

    # link_num = count of off-diagonal prob entries > 0.25, per query
    linked = jnp.where(jnp.logical_and(prob > LINK_THRES, jnp.logical_not(eye)),
                       jnp.float32(1.0), jnp.float32(0.0))
    link = jnp.sum(linked, axis=0, keepdims=True)                    # (1, 4) f32

    # --- write ONE lane-dense output slab (single output block DMA) ---
    out_ref[0:AGENTS, :] = feat
    out_ref[AGENTS:SLAB_ROWS, :] = jnp.zeros((SLAB_ROWS - AGENTS, FEAT), jnp.float32)
    out_ref[AGENTS:SLAB_ROWS, 0:AGENTS] = prob
    out_ref[AGENTS:AGENTS + 1, AGENTS:2 * AGENTS] = first_idx
    out_ref[AGENTS:AGENTS + 1, 2 * AGENTS:3 * AGENTS] = link


def mimocom_forward(inputs, params):
    """inputs: (4, 256) f32 == agent_num x (16*4*4) flattened feature maps."""
    vmem = pl.BlockSpec(memory_space=pltpu.MemorySpace.VMEM)

    slab = pl.pallas_call(
        mimocom_kernel,
        out_shape=jax.ShapeDtypeStruct((SLAB_ROWS, FEAT), jnp.float32),
        in_specs=[vmem] * 5,
        out_specs=vmem,
        cost_estimate=pl.CostEstimate(
            flops=1_064_960,          # 3 MLP matmuls + attn + value mix
            transcendentals=32,       # 16 exps + softmax divisions
            bytes_accessed=277_000),  # ~256 KiB bf16 weights + acts + biases + out slab
    )(inputs, params["w1"], params["w2"], params["wq"], params["b"])

    # Wrapper glue: slice the packed slab back into the PyTorch output shapes.
    feat_fuse = slab[0:AGENTS, :].reshape(1, AGENTS, 16, 4, 4)          # (1, 4, 16, 4, 4)
    prob_action = slab[AGENTS:SLAB_ROWS, 0:AGENTS][None]                # (1, 4, 4)
    action = slab[AGENTS, AGENTS:2 * AGENTS].astype(jnp.int32)[None]    # (1, 4)
    link_num = slab[AGENTS, 2 * AGENTS:3 * AGENTS].astype(jnp.int32)    # (4,)
    num_connect = AGENTS - 1                                            # training branch: 3
    return feat_fuse, prob_action, action, num_connect, link_num


def init_params(key):
    """Kernel-ready parameters: pre-transposed bf16 weights, packed (1, 640) f32 bias,
    fc3 + attention-Linear folded into (wq, bq)."""
    ks = jax.random.split(key, 8)

    def lin(kw, kb, out_dim, in_dim, scale):
        # PyTorch nn.Linear layout: weight (out, in), bias (out,)
        w = jax.random.normal(kw, (out_dim, in_dim), jnp.float32) * scale
        b = jax.random.normal(kb, (out_dim,), jnp.float32) * 0.01
        return w, b

    w1, b1 = lin(ks[0], ks[1], HID1, FEAT, 0.05)             # km_generator fc1
    w2, b2 = lin(ks[2], ks[3], HID2, HID1, 0.05)             # km_generator fc2
    w3, b3 = lin(ks[4], ks[5], QUERY_SIZE, HID2, 0.05)       # km_generator fc3
    wa, ba = lin(ks[6], ks[7], KEY_SIZE, QUERY_SIZE, 0.05)   # attention_net.linear

    # Fold fc3 + attention Linear: (h2 @ W3^T + b3) @ Wa^T + ba
    wq = w3.T @ wa.T                                         # (128, 256)
    bq = b3 @ wa.T + ba                                      # (256,)
    b_packed = jnp.concatenate([b1, b2, bq]).reshape(1, B_TOT)

    # NOTE: Gate MLP is constructed in PyTorch __init__ but never used in forward() -> omitted.
    return dict(
        w1=jnp.asarray(w1.T, jnp.bfloat16),   # (256, 256)
        w2=jnp.asarray(w2.T, jnp.bfloat16),   # (256, 128)
        wq=jnp.asarray(wq, jnp.bfloat16),     # (128, 256)
        b=b_packed,                           # (1, 640) f32
    )


def reference_forward(inputs, params):
    """Plain-JAX reference using the SAME bf16 weights (isolates kernel-vs-XLA differences)."""
    b1 = params["b"][:, B1_OFF:B2_OFF]
    b2 = params["b"][:, B2_OFF:BQ_OFF]
    bq = params["b"][:, BQ_OFF:B_TOT]
    h1 = jax.nn.relu(jnp.dot(inputs.astype(jnp.bfloat16), params["w1"],
                             preferred_element_type=jnp.float32) + b1)
    h2 = jax.nn.relu(jnp.dot(h1.astype(jnp.bfloat16), params["w2"],
                             preferred_element_type=jnp.float32) + b2)
    query = jnp.dot(h2.astype(jnp.bfloat16), params["wq"],
                    preferred_element_type=jnp.float32) + bq
    attn = inputs @ query.T
    soft = jax.nn.softmax(attn, axis=0)
    feat = soft.T @ inputs
    prob = soft + 0.001 * jnp.eye(AGENTS, dtype=jnp.float32)
    return feat, prob


if __name__ == "__main__":
    key = jax.random.PRNGKey(0)
    k_in, k_par = jax.random.split(key)
    # inputs: (agent_num = 4, 16*4*4 = 256), consistent with inputs.view(1, 4, 16, 4, 4).
    inputs = jax.random.normal(k_in, (AGENTS, FEAT), jnp.float32)
    params = init_params(k_par)

    feat_fuse, prob_action, action, num_connect, link_num = mimocom_forward(inputs, params)
    jax.block_until_ready((feat_fuse, prob_action, action, link_num))

    # Shape checks against the PyTorch forward (training=True).
    assert feat_fuse.shape == (1, AGENTS, 16, 4, 4)
    assert prob_action.shape == (1, AGENTS, AGENTS)
    assert action.shape == (1, AGENTS)
    assert link_num.shape == (AGENTS,)
    assert num_connect == AGENTS - 1

    # Numerical check vs plain-JAX reference with identical bf16 weights (loose tol).
    feat_ref, prob_ref = reference_forward(inputs, params)
    np.testing.assert_allclose(np.asarray(feat_fuse).reshape(AGENTS, FEAT),
                               np.asarray(feat_ref), rtol=2e-2, atol=2e-2)
    np.testing.assert_allclose(np.asarray(prob_action[0]),
                               np.asarray(prob_ref), rtol=2e-2, atol=2e-2)

    # Discrete-output check: argmax / link counting, verified against the kernel's own prob.
    prob_k = np.asarray(prob_action[0])
    assert np.array_equal(np.asarray(action[0]), np.argmax(prob_k, axis=0))
    assert np.array_equal(
        np.asarray(link_num),
        np.sum((prob_k > LINK_THRES) & ~np.eye(AGENTS, dtype=bool), axis=0))

    print("KERNEL_OK")
</pallas_src>

<mosaic_0001>
module attributes {stable_mosaic.version = 11 : i64} {
  func.func @mimocom_kernel(%arg0: memref<4x256xf32, #tpu.memory_space<vmem>>, %arg1: memref<256x256xbf16, #tpu.memory_space<vmem>>, %arg2: memref<256x128xbf16, #tpu.memory_space<vmem>>, %arg3: memref<128x256xbf16, #tpu.memory_space<vmem>>, %arg4: memref<1x640xf32, #tpu.memory_space<vmem>>, %arg5: memref<8x256xf32, #tpu.memory_space<vmem>>) attributes {dimension_semantics = [], scalar_prefetch = 0 : i64, scratch_operands = 0 : i64, tpu.core_type = #tpu.core_type<tc>} {
    %c0 = arith.constant 0 : index
    %c0_0 = arith.constant 0 : index
    %0 = vector.load %arg0[%c0, %c0_0] : memref<4x256xf32, #tpu.memory_space<vmem>>, vector<4x256xf32>
    %c0_1 = arith.constant 0 : index
    %c0_2 = arith.constant 0 : index
    %1 = vector.load %arg4[%c0_1, %c0_2] : memref<1x640xf32, #tpu.memory_space<vmem>>, vector<1x256xf32>
    %c0_3 = arith.constant 0 : index
    %c256 = arith.constant 256 : index
    %2 = vector.load %arg4[%c0_3, %c256] : memref<1x640xf32, #tpu.memory_space<vmem>>, vector<1x128xf32>
    %c0_4 = arith.constant 0 : index
    %c384 = arith.constant 384 : index
    %3 = vector.load %arg4[%c0_4, %c384] : memref<1x640xf32, #tpu.memory_space<vmem>>, vector<1x256xf32>
    %4 = arith.truncf %0 : vector<4x256xf32> to vector<4x256xbf16>
    %c0_5 = arith.constant 0 : index
    %c0_6 = arith.constant 0 : index
    %5 = vector.load %arg1[%c0_5, %c0_6] : memref<256x256xbf16, #tpu.memory_space<vmem>>, vector<256x256xbf16>
    %cst = arith.constant dense<0.000000e+00> : vector<4x256xf32>
    %6 = tpu.matmul %4, %5, %cst {dimension_numbers = #tpu.dot_dimension_numbers<[1], [0], [0], [1], [0, 0, 1, 1], [], []>} : vector<4x256xbf16>, vector<256x256xbf16>, vector<4x256xf32> -> vector<4x256xf32>
    %7 = vector.broadcast %1 : vector<1x256xf32> to vector<4x256xf32>
    %8 = arith.addf %6, %7 : vector<4x256xf32>
    %cst_7 = arith.constant 0.000000e+00 : f32
    %9 = vector.broadcast %cst_7 : f32 to vector<4x256xf32>
    %10 = arith.maximumf %8, %9 : vector<4x256xf32>
    %11 = arith.truncf %10 : vector<4x256xf32> to vector<4x256xbf16>
    %c0_8 = arith.constant 0 : index
    %c0_9 = arith.constant 0 : index
    %12 = vector.load %arg2[%c0_8, %c0_9] : memref<256x128xbf16, #tpu.memory_space<vmem>>, vector<256x128xbf16>
    %cst_10 = arith.constant dense<0.000000e+00> : vector<4x128xf32>
    %13 = tpu.matmul %11, %12, %cst_10 {dimension_numbers = #tpu.dot_dimension_numbers<[1], [0], [0], [1], [0, 0, 1, 1], [], []>} : vector<4x256xbf16>, vector<256x128xbf16>, vector<4x128xf32> -> vector<4x128xf32>
    %14 = vector.broadcast %2 : vector<1x128xf32> to vector<4x128xf32>
    %15 = arith.addf %13, %14 : vector<4x128xf32>
    %cst_11 = arith.constant 0.000000e+00 : f32
    %16 = vector.broadcast %cst_11 : f32 to vector<4x128xf32>
    %17 = arith.maximumf %15, %16 : vector<4x128xf32>
    %18 = arith.truncf %17 : vector<4x128xf32> to vector<4x128xbf16>
    %c0_12 = arith.constant 0 : index
    %c0_13 = arith.constant 0 : index
    %19 = vector.load %arg3[%c0_12, %c0_13] : memref<128x256xbf16, #tpu.memory_space<vmem>>, vector<128x256xbf16>
    %cst_14 = arith.constant dense<0.000000e+00> : vector<4x256xf32>
    %20 = tpu.matmul %18, %19, %cst_14 {dimension_numbers = #tpu.dot_dimension_numbers<[1], [0], [0], [1], [0, 0, 1, 1], [], []>} : vector<4x128xbf16>, vector<128x256xbf16>, vector<4x256xf32> -> vector<4x256xf32>
    %21 = vector.broadcast %3 : vector<1x256xf32> to vector<4x256xf32>
    %22 = arith.addf %20, %21 : vector<4x256xf32>
    %cst_15 = arith.constant dense<0.000000e+00> : vector<4x4xf32>
    %23 = tpu.matmul %0, %22, %cst_15 {dimension_numbers = #tpu.dot_dimension_numbers<[1], [1], [0], [0], [0, 0, 1, 0], [], []>} : vector<4x256xf32>, vector<4x256xf32>, vector<4x4xf32> -> vector<4x4xf32>
    %cst_16 = arith.constant dense<0xFF800000> : vector<4xf32>
    %24 = vector.multi_reduction <maximumf>, %23, %cst_16 [0] : vector<4x4xf32> to vector<4xf32>
    %25 = vector.shape_cast %24 : vector<4xf32> to vector<1x4xf32>
    %26 = vector.broadcast %25 : vector<1x4xf32> to vector<4x4xf32>
    %27 = arith.subf %23, %26 : vector<4x4xf32>
    %28 = math.exp %27 : vector<4x4xf32>
    %cst_17 = arith.constant dense<0.000000e+00> : vector<4xf32>
    %29 = vector.multi_reduction <add>, %28, %cst_17 [0] : vector<4x4xf32> to vector<4xf32>
    %30 = vector.shape_cast %29 : vector<4xf32> to vector<1x4xf32>
    %31 = vector.broadcast %30 : vector<1x4xf32> to vector<4x4xf32>
    %32 = arith.divf %28, %31 : vector<4x4xf32>
    %cst_18 = arith.constant dense<0.000000e+00> : vector<4x256xf32>
    %33 = tpu.matmul %32, %0, %cst_18 {dimension_numbers = #tpu.dot_dimension_numbers<[0], [0], [1], [1], [0, 1, 1, 1], [], []>} : vector<4x4xf32>, vector<4x256xf32>, vector<4x256xf32> -> vector<4x256xf32>
    %34 = tpu.iota {dimensions = array<i32: 0>} : vector<4x4xi32>
    %35 = tpu.iota {dimensions = array<i32: 1>} : vector<4x4xi32>
    %36 = arith.cmpi eq, %34, %35 : vector<4x4xi32>
    %cst_19 = arith.constant 1.000000e-03 : f32
    %cst_20 = arith.constant 0.000000e+00 : f32
    %37 = vector.broadcast %cst_19 : f32 to vector<4x4xf32>
    %38 = vector.broadcast %cst_20 : f32 to vector<4x4xf32>
    %39 = arith.select %36, %37, %38 : vector<4x4xi1>, vector<4x4xf32>
    %40 = arith.addf %32, %39 : vector<4x4xf32>
    %cst_21 = arith.constant dense<0xFF800000> : vector<4xf32>
    %41 = vector.multi_reduction <maximumf>, %40, %cst_21 [0] : vector<4x4xf32> to vector<4xf32>
    %42 = vector.shape_cast %41 : vector<4xf32> to vector<1x4xf32>
    %43 = vector.broadcast %42 : vector<1x4xf32> to vector<4x4xf32>
    %44 = arith.cmpf oeq, %40, %43 : vector<4x4xf32>
    %45 = arith.sitofp %34 : vector<4x4xi32> to vector<4x4xf32>
    %cst_22 = arith.constant 4.000000e+00 : f32
    %46 = vector.broadcast %cst_22 : f32 to vector<4x4xf32>
    %47 = arith.select %44, %45, %46 : vector<4x4xi1>, vector<4x4xf32>
    %cst_23 = arith.constant dense<0x7F800000> : vector<4xf32>
    %48 = vector.multi_reduction <minimumf>, %47, %cst_23 [0] : vector<4x4xf32> to vector<4xf32>
    %49 = vector.shape_cast %48 : vector<4xf32> to vector<1x4xf32>
    %cst_24 = arith.constant 2.500000e-01 : f32
    %50 = vector.broadcast %cst_24 : f32 to vector<4x4xf32>
    %51 = arith.cmpf ogt, %40, %50 : vector<4x4xf32>
    %cst_25 = arith.constant dense<true> : vector<4x4xi1>
    %52 = arith.xori %36, %cst_25 : vector<4x4xi1>
    %53 = arith.andi %51, %52 : vector<4x4xi1>
    %cst_26 = arith.constant 1.000000e+00 : f32
    %cst_27 = arith.constant 0.000000e+00 : f32
    %54 = vector.broadcast %cst_26 : f32 to vector<4x4xf32>
    %55 = vector.broadcast %cst_27 : f32 to vector<4x4xf32>
    %56 = arith.select %53, %54, %55 : vector<4x4xi1>, vector<4x4xf32>
    %cst_28 = arith.constant dense<0.000000e+00> : vector<4xf32>
    %57 = vector.multi_reduction <add>, %56, %cst_28 [0] : vector<4x4xf32> to vector<4xf32>
    %58 = vector.shape_cast %57 : vector<4xf32> to vector<1x4xf32>
    %c0_29 = arith.constant 0 : index
    %c0_30 = arith.constant 0 : index
    %59 = vector.load %arg5[%c0_29, %c0_30] : memref<8x256xf32, #tpu.memory_space<vmem>>, vector<4x256xf32>
    tpu.vector_store %arg5[%c0_29, %c0_30], %33 {strides = array<i32>} : memref<8x256xf32, #tpu.memory_space<vmem>>, vector<4x256xf32>,
    %cst_31 = arith.constant 0.000000e+00 : f32
    %60 = vector.broadcast %cst_31 : f32 to vector<4x256xf32>
    %c4 = arith.constant 4 : index
    %c0_32 = arith.constant 0 : index
    %61 = vector.load %arg5[%c4, %c0_32] : memref<8x256xf32, #tpu.memory_space<vmem>>, vector<4x256xf32>
    tpu.vector_store %arg5[%c4, %c0_32], %60 {strides = array<i32>} : memref<8x256xf32, #tpu.memory_space<vmem>>, vector<4x256xf32>,
    %c4_33 = arith.constant 4 : index
    %c0_34 = arith.constant 0 : index
    %62 = vector.load %arg5[%c4_33, %c0_34] : memref<8x256xf32, #tpu.memory_space<vmem>>, vector<4x4xf32>
    tpu.vector_store %arg5[%c4_33, %c0_34], %40 {strides = array<i32>} : memref<8x256xf32, #tpu.memory_space<vmem>>, vector<4x4xf32>,
    %c4_35 = arith.constant 4 : index
    %c4_36 = arith.constant 4 : index
    %63 = vector.load %arg5[%c4_35, %c4_36] : memref<8x256xf32, #tpu.memory_space<vmem>>, vector<1x4xf32>
    tpu.vector_store %arg5[%c4_35, %c4_36], %49 {strides = array<i32>} : memref<8x256xf32, #tpu.memory_space<vmem>>, vector<1x4xf32>,
    %c4_37 = arith.constant 4 : index
    %c8 = arith.constant 8 : index
    %64 = vector.load %arg5[%c4_37, %c8] : memref<8x256xf32, #tpu.memory_space<vmem>>, vector<1x4xf32>
    tpu.vector_store %arg5[%c4_37, %c8], %58 {strides = array<i32>} : memref<8x256xf32, #tpu.memory_space<vmem>>, vector<1x4xf32>,
    return
  }
}

</mosaic_0001>

<bundles_post_ra>
// kernel: tpu_custom_call.1
= control target key start
LH: loop header
LB: loop body
LE: loop exit
PB: predicated region body
PF: predicated region fallthrough
CT: control target
= control target key end

     0   :  { %10 = vsyncpa [#allocation3], 0  ;;  %s1391_s0 = inlined_call_operand.hbm [shape: f32[4,256], index: 0, kind: input, shape index: {}]   ;;  %s1392_s1 = inlined_call_operand.hbm [shape: bf16[256,256], index: 1, kind: input, shape index: {}]   ;;  %s1393_s2 = inlined_call_operand.hbm [shape: bf16[256,128], index: 2, kind: input, shape index: {}]   ;;  %s1394_s3 = inlined_call_operand.hbm [shape: bf16[128,256], index: 3, kind: input, shape index: {}]   ;;  %s1395_s4 = inlined_call_operand.vmem [shape: f32[1,640], index: 4, kind: input, shape index: {}]   ;;  %s1396_s5 = inlined_call_operand.hbm [shape: f32[8,256], index: 5, kind: output, shape index: {}]  }
   0x1   :  { %11 = vsyncpa [#allocation6], 0 }
   0x2   :  { %12 = vsyncpa [#allocation9], 0 }
   0x3   :  { %13 = vsyncpa [#allocation4], 0  ;;  %s1244_s18 = smov [#allocation5]   ;;  %s1126_s22 = scalar_lea.hbm %s1392_s1, 4096 }
   0x4   :  { %s29_s19 = sshll.u32 %s1244_s18, 4  ;;  %p1127_p0 = scmp.ne.s32.totalorder %s1392_s1, %s1126_s22  ;;  %s30_s19 = int_to_ptr.vmem [resolvable:$true] %s29_s19 }
   0x5   :  { %p1130_p1 = scmp.lt.u32.totalorder %s1126_s22, %s1392_s1 }
   0x7   :  { %p1132_p2 = pnand %p1130_p1, %p1127_p0 }
   0x9   :  { %1135 = shalt.err (!%p1132_p2)
}
   0xa   :  { %s1136_s27 = scalar_lea.vmem %s30_s19, 4096  ;;  %p1141_p4 = scmp.lt.s32.totalorder %s30_s19, %s30_s19 }
   0xb   :  { %p1137_p3 = scmp.ne.s32.totalorder %s30_s19, %s1136_s27  ;;  %p1142_p5 = scmp.lt.s32.totalorder %s1136_s27, %s1136_s27 }
   0xd   :  { %p1143_p6 = por %p1142_p5, %p1141_p4 }
   0xf   :  { %p1144_p7 = pnand %p1143_p6, %p1137_p3 }
  0x11   :  { %1147 = shalt.err (!%p1144_p7)
}
  0x12   :  { %s1245_s28 = smov 128   ;;  %s1246_s29 = smov 8  }
  0x13   :  { %35 = dma.hbm_to_vmem [thread:$0]  %s1392_s1, 4096, %s30_s19, [#allocation6], %s1245_s28, %s1245_s28, %s1246_s29  }
  0x14   :  { %s1247_s7 = smov [#allocation2]   ;;  %s1248_s9 = smov [#allocation7]  }
  0x15   :  { %s20_s8 = sshll.u32 %s1247_s7, 4  ;;  %s41_s10 = sshll.u32 %s1248_s9, 4  ;;  %s21_s8 = int_to_ptr.vmem [resolvable:$true] %s20_s8  ;;  %s42_s10 = int_to_ptr.vmem [resolvable:$true] %s41_s10 }
  0x16   :  { %s1148_s13 = scalar_lea.hbm %s1391_s0, 128 }
  0x17   :  { %p1149_p8 = scmp.ne.s32.totalorder %s1391_s0, %s1148_s13  ;;  %p1152_p9 = scmp.lt.u32.totalorder %s1148_s13, %s1391_s0 }
  0x19   :  { %p1154_p10 = pnand %p1152_p9, %p1149_p8 }
  0x1b   :  { %1157 = shalt.err (!%p1154_p10)
}
  0x1c   :  { %s1158_s1 = scalar_lea.vmem %s21_s8, 128  ;;  %p1163_p12 = scmp.lt.s32.totalorder %s21_s8, %s21_s8 }
  0x1d   :  { %p1159_p11 = scmp.ne.s32.totalorder %s21_s8, %s1158_s1  ;;  %p1164_p13 = scmp.lt.s32.totalorder %s1158_s1, %s1158_s1 }
  0x1f   :  { %p1165_p0 = por %p1164_p13, %p1163_p12 }
  0x21   :  { %p1166_p1 = pnand %p1165_p0, %p1159_p11 }
  0x23   :  { %1169 = shalt.err (!%p1166_p1)
}
  0x24   :  { %23 = dma.hbm_to_vmem [thread:$0]  %s1391_s0, 128, %s21_s8, [#allocation3]  }
  0x25   :  { %s1170_s22 = scalar_lea.hbm %s1393_s2, 2048 }
  0x26   :  { %p1171_p2 = scmp.ne.s32.totalorder %s1393_s2, %s1170_s22  ;;  %p1174_p3 = scmp.lt.u32.totalorder %s1170_s22, %s1393_s2 }
  0x28   :  { %p1176_p4 = pnand %p1174_p3, %p1171_p2 }
  0x2a   :  { %1179 = shalt.err (!%p1176_p4)
}
  0x2b   :  { %s1180_s27 = scalar_lea.vmem %s42_s10, 2048  ;;  %p1185_p6 = scmp.lt.s32.totalorder %s42_s10, %s42_s10 }
  0x2c   :  { %p1181_p5 = scmp.ne.s32.totalorder %s42_s10, %s1180_s27  ;;  %p1186_p7 = scmp.lt.s32.totalorder %s1180_s27, %s1180_s27 }
  0x2e   :  { %p1187_p8 = por %p1186_p7, %p1185_p6 }
  0x30   :  { %p1188_p9 = pnand %p1187_p8, %p1181_p5 }
  0x32   :  { %1191 = shalt.err (!%p1188_p9)
}
  0x33   :  { %s1249_s0 = smov 64   ;;  %s1250_s30 = smov 4  }
  0x34   :  { %47 = dma.hbm_to_vmem [thread:$0]  %s1393_s2, 2048, %s42_s10, [#allocation6], %s1249_s0, %s1249_s0, %s1250_s30  }
  0x35   :  { %s1251_s8 = smov [#allocation8]   ;;  %s1192_s13 = scalar_lea.hbm %s1394_s3, 2048 }
  0x36   :  { %s53_s9 = sshll.u32 %s1251_s8, 4  ;;  %p1193_p10 = scmp.ne.s32.totalorder %s1394_s3, %s1192_s13  ;;  %s54_s9 = int_to_ptr.vmem [resolvable:$true] %s53_s9 }
  0x37   :  { %p1196_p11 = scmp.lt.u32.totalorder %s1192_s13, %s1394_s3 }
  0x39   :  { %p1198_p12 = pnand %p1196_p11, %p1193_p10 }
  0x3b   :  { %1201 = shalt.err (!%p1198_p12)
}
  0x3c   :  { %s1202_s1 = scalar_lea.vmem %s54_s9, 2048  ;;  %p1207_p0 = scmp.lt.s32.totalorder %s54_s9, %s54_s9 }
  0x3d   :  { %p1203_p13 = scmp.ne.s32.totalorder %s54_s9, %s1202_s1  ;;  %p1208_p1 = scmp.lt.s32.totalorder %s1202_s1, %s1202_s1 }
  0x3f   :  { %p1209_p2 = por %p1208_p1, %p1207_p0 }
  0x41   :  { %p1210_p3 = pnand %p1209_p2, %p1203_p13 }
  0x43   :  { %1213 = shalt.err (!%p1210_p3)
}
  0x44   :  { %59 = dma.hbm_to_vmem [thread:$0]  %s1394_s3, 2048, %s54_s9, [#allocation9], %s1245_s28, %s1245_s28, %s1246_s29  }
  0x45   :  { %1236 = dma.done.wait [#allocation3], 128  }
  0x46   :  { %1237 = vsyncadd [#allocation3], 4294967168 }
  0x47   :  { %1238 = dma.done.wait [#allocation6], 6144  }
  0x48   :  { %1239 = vsyncadd [#allocation6], 4294961152 }
  0x49   :  { %1240 = dma.done.wait [#allocation9], 2048  }
  0x4a   :  { %1241 = vsyncadd [#allocation9], 4294965248  ;;  %v1033_v0 = vld [vmem:[#allocation5 + $0x4] ss:$8 sps:$4 sm:$0xff]   ;;  %v1035_v1 = vld [vmem:[#allocation5] ss:$8 sps:$4 sm:$0xff]   ;;  %v117_v53 = vlaneseq }
  0x4b   :  { %287 = vmatprep.subr.bf16.mxu0 %v1033_v0  ;;  %v1036_v2 = vld [vmem:[#allocation5 + $0x14] ss:$8 sps:$4 sm:$0xff]   ;;  %v1038_v3 = vld [vmem:[#allocation5 + $0x10] ss:$8 sps:$4 sm:$0xff]   ;;  %v1039_v4 = vld [vmem:[#allocation5 + $0x24] ss:$8 sps:$4 sm:$0xff]  }
  0x4c   :  { %288 = vmatpush1.bf16.msra.mxu0 %v1035_v1  ;;  %v1041_v5 = vld [vmem:[#allocation5 + $0x20] ss:$8 sps:$4 sm:$0xff]   ;;  %v1042_v6 = vld [vmem:[#allocation5 + $0x34] ss:$8 sps:$4 sm:$0xff]   ;;  %v1044_v7 = vld [vmem:[#allocation5 + $0x30] ss:$8 sps:$4 sm:$0xff]  }
  0x4d   :  { %289 = vmatprep.subr.bf16.mxu0 %v1036_v2  ;;  %v1045_v8 = vld [vmem:[#allocation5 + $0x44] ss:$8 sps:$4 sm:$0xff]   ;;  %v1047_v9 = vld [vmem:[#allocation5 + $0x40] ss:$8 sps:$4 sm:$0xff]   ;;  %v1048_v10 = vld [vmem:[#allocation5 + $0x54] ss:$8 sps:$4 sm:$0xff]  }
  0x4e   :  { %v1050_v11 = vld [vmem:[#allocation5 + $0x50] ss:$8 sps:$4 sm:$0xff]   ;;  %v1051_v12 = vld [vmem:[#allocation5 + $0x64] ss:$8 sps:$4 sm:$0xff]   ;;  %v1053_v13 = vld [vmem:[#allocation5 + $0x60] ss:$8 sps:$4 sm:$0xff]  }
  0x4f   :  { %v1341_v14 = vld [vmem:[#allocation2] sm:$0xff]  ;;  %v1082_v17 = vld [vmem:[#allocation7 + $0x40] sm:$0xff]   ;;  %v1084_v20 = vld [vmem:[#allocation7 + $0x48] sm:$0xff]   ;;  %v1353_v54 = vshrl.u32 %v117_v53, 7  ;;  %vm782_vm0 = vcmask 1043456   ;;  %vm726_vm1 = vcmask 27648  }
  0x50   :  { %290 = vmatpush1.bf16.msra.mxu0 %v1038_v3  ;;  %v1054_v15 = vld [vmem:[#allocation5 + $0x74] ss:$8 sps:$4 sm:$0xff]   ;;  %v1345_v16 = vcombine.high %v1341_v14, %v1341_v14  ;;  %v1083_v18 = vld [vmem:[#allocation7] sm:$0xff]   ;;  %999 = vmatprep.subr.bf16.mxu1 %v1082_v17  ;;  %v1085_v21 = vld [vmem:[#allocation7 + $0x8] sm:$0xff]   ;;  %v82_v47 = vpack.c.bf16 %v1341_v14, %v1341_v14  ;;  %vm1254_vm3 = vmmov 1   ;;  %vm900_vm5 = vcmask 31748  }
  0x51   :  { %291 = vmatprep.subr.bf16.mxu0 %v1039_v4  ;;  %1000 = vmatpush3.bf16.msra.mxu1 %v1083_v18  ;;  %v1086_v22 = vld [vmem:[#allocation7 + $0x50] sm:$0xff]   ;;  %v1057_v24 = vld [vmem:[#allocation5 + $0x84] ss:$8 sps:$4 sm:$0xff]   ;;  %v1088_v26 = vld [vmem:[#allocation7 + $0x58] sm:$0xff]   ;;  %v119_v55 = vsub.s32 0, %v1353_v54  ;;  %v123_v57 = vsub.s32 1, %v1353_v54 }
  0x52   :  { %v83_v19 = vpack.c.bf16 %v1345_v16, %v1345_v16  ;;  %1001 = vmatprep.subr.bf16.mxu1 %v1084_v20  ;;  %v1056_v23 = vld [vmem:[#allocation5 + $0x70] ss:$8 sps:$4 sm:$0xff]   ;;  %v1059_v27 = vld [vmem:[#allocation5 + $0x80] ss:$8 sps:$4 sm:$0xff]   ;;  %v1060_v28 = vld [vmem:[#allocation5 + $0x94] ss:$8 sps:$4 sm:$0xff]  }
  0x53   :  { %v1087_v25 = vld [vmem:[#allocation7 + $0x10] sm:$0xff]   ;;  %v1089_v30 = vld [vmem:[#allocation7 + $0x18] sm:$0xff]   ;;  %v1090_v31 = vld [vmem:[#allocation7 + $0x60] sm:$0xff]   ;;  %vm778_vm9 = vcmask 31744   ;;  %vm906_vm10 = vcmask 57376   ;;  %vm912_vm11 = vcmask 90176  }
  0x54   :  { %292 = vmatpush1.bf16.msra.mxu0 %v1041_v5  ;;  %319 = vmatprep.mubr.bf16.mxu0 %v83_v19  ;;  %v1062_v29 = vld [vmem:[#allocation5 + $0x90] ss:$8 sps:$4 sm:$0xff]   ;;  %v1063_v32 = vld [vmem:[#allocation5 + $0xa4] ss:$8 sps:$4 sm:$0xff]   ;;  %v1065_v35 = vld [vmem:[#allocation5 + $0xa0] ss:$8 sps:$4 sm:$0xff]  }
  0x55   :  { %293 = vmatprep.subr.bf16.mxu0 %v1042_v6  ;;  %1002 = vmatpush3.bf16.msra.mxu1 %v1085_v21  ;;  %v1091_v33 = vld [vmem:[#allocation7 + $0x20] sm:$0xff]   ;;  %v1092_v34 = vld [vmem:[#allocation7 + $0x68] sm:$0xff]   ;;  %v1066_v36 = vld [vmem:[#allocation5 + $0xb4] ss:$8 sps:$4 sm:$0xff]  }
  0x56   :  { %1003 = vmatprep.subr.bf16.mxu1 %v1086_v22  ;;  %v1093_v37 = vld [vmem:[#allocation7 + $0x28] sm:$0xff]   ;;  %v1068_v38 = vld [vmem:[#allocation5 + $0xb0] ss:$8 sps:$4 sm:$0xff]   ;;  %v1072_v41 = vld [vmem:[#allocation5 + $0xd4] ss:$8 sps:$4 sm:$0xff]  }
  0x57   :  { %v1069_v39 = vld [vmem:[#allocation5 + $0xc4] ss:$8 sps:$4 sm:$0xff]   ;;  %v1071_v40 = vld [vmem:[#allocation5 + $0xc0] ss:$8 sps:$4 sm:$0xff]   ;;  %v1074_v42 = vld [vmem:[#allocation5 + $0xd0] ss:$8 sps:$4 sm:$0xff]  }
  0x58   :  { %294 = vmatpush1.bf16.msra.mxu0 %v1044_v7  ;;  %v1075_v43 = vld [vmem:[#allocation5 + $0xe4] ss:$8 sps:$4 sm:$0xff]   ;;  %v1077_v44 = vld [vmem:[#allocation5 + $0xe0] ss:$8 sps:$4 sm:$0xff]   ;;  %v1078_v45 = vld [vmem:[#allocation5 + $0xf4] ss:$8 sps:$4 sm:$0xff]  }
  0x59   :  { %295 = vmatprep.subr.bf16.mxu0 %v1045_v8  ;;  %1004 = vmatpush3.bf16.msra.mxu1 %v1087_v25  ;;  %v1080_v46 = vld [vmem:[#allocation5 + $0xf0] ss:$8 sps:$4 sm:$0xff]   ;;  %v1100_v52 = vld [vmem:[#allocation8 + $0x4] ss:$8 sps:$4 sm:$0xff]   ;;  %v1098_v5 = vld [vmem:[#allocation8] ss:$8 sps:$4 sm:$0xff]  }
  0x5a   :  { %1005 = vmatprep.subr.bf16.mxu1 %v1088_v26  ;;  %v1094_v48 = vld [vmem:[#allocation7 + $0x70] sm:$0xff]   ;;  %v1096_v50 = vld [vmem:[#allocation7 + $0x78] sm:$0xff]   ;;  %v1118_v19 = vld [vmem:[#allocation8 + $0x64] ss:$8 sps:$4 sm:$0xff]  }
  0x5b   :  { %v1095_v49 = vld [vmem:[#allocation7 + $0x30] sm:$0xff]   ;;  %v1097_v51 = vld [vmem:[#allocation7 + $0x38] sm:$0xff]   ;;  %v1116_v20 = vld [vmem:[#allocation8 + $0x60] ss:$8 sps:$4 sm:$0xff]  }
  0x5c   :  { %296 = vmatpush1.bf16.msra.mxu0 %v1047_v9  ;;  %v76_v56 = vld [vmem:[%s1395_s4] sm:$0x3]  ;;  %v1103_v7 = vld [vmem:[#allocation8 + $0x14] ss:$8 sps:$4 sm:$0xff]   ;;  %v1106_v9 = vld [vmem:[#allocation8 + $0x24] ss:$8 sps:$4 sm:$0xff]  }
  0x5d   :  { %297 = vmatprep.subr.bf16.mxu0 %v1048_v10  ;;  %1006 = vmatpush3.bf16.msra.mxu1 %v1089_v30  ;;  %v120_v58 = vrot.slane %v76_v56, %v119_v55  ;;  %v124_v59 = vrot.slane %v76_v56, %v123_v57  ;;  %v1101_v8 = vld [vmem:[#allocation8 + $0x10] ss:$8 sps:$4 sm:$0xff]   ;;  %v1104_v10 = vld [vmem:[#allocation8 + $0x20] ss:$8 sps:$4 sm:$0xff]   ;;  %v1115_v17 = vld [vmem:[#allocation8 + $0x54] ss:$8 sps:$4 sm:$0xff]  }
  0x5e   :  { %1007 = vmatprep.subr.bf16.mxu1 %v1090_v31  ;;  %v1113_v18 = vld [vmem:[#allocation8 + $0x50] ss:$8 sps:$4 sm:$0xff]   ;;  %v1121_v21 = vld [vmem:[#allocation8 + $0x74] ss:$8 sps:$4 sm:$0xff]  }
  0x5f   :  { %v1119_v22 = vld [vmem:[#allocation8 + $0x70] ss:$8 sps:$4 sm:$0xff]  }
  0x60   :  { %298 = vmatpush1.bf16.msra.mxu0 %v1050_v11  ;;  %v1109_v11 = vld [vmem:[#allocation8 + $0x34] ss:$8 sps:$4 sm:$0xff]   ;;  %v963_v25 = vld [vmem:[%s1395_s4 + $0x2] ss:$0 sm:$0xff] }
  0x61   :  { %299 = vmatprep.subr.bf16.mxu0 %v1051_v12  ;;  %1008 = vmatpush3.bf16.msra.mxu1 %v1091_v33  ;;  %v1107_v12 = vld [vmem:[#allocation8 + $0x30] ss:$8 sps:$4 sm:$0xff]  }
  0x62   :  { %1009 = vmatprep.subr.bf16.mxu1 %v1092_v34  ;;  %v78_v33 = vld [vmem:[%s1395_s4 + $0x3] sm:$0x3]  ;;  %s1255_s4 = smov [#allocation10]  }
  0x63   :  { %v532_v34 = vrot.slane %v78_v33, %v123_v57  ;;  %s920_s22 = sshll.u32 %s1255_s4, 4  ;;  %s921_s22 = int_to_ptr.vmem [resolvable:$true] %s920_s22 }
  0x64   :  { %300 = vmatpush1.bf16.msra.mxu0 %v1053_v13  ;;  %v1112_v13 = vld [vmem:[#allocation8 + $0x44] ss:$8 sps:$4 sm:$0xff]   ;;  %p1219_p5 = scmp.lt.s32.totalorder %s921_s22, %s921_s22 }
  0x65   :  { %301 = vmatprep.subr.bf16.mxu0 %v1054_v15  ;;  %1010 = vmatpush3.bf16.msra.mxu1 %v1093_v37  ;;  %v1110_v15 = vld [vmem:[#allocation8 + $0x40] ss:$8 sps:$4 sm:$0xff]  }
  0x66   :  { %1011 = vmatprep.subr.bf16.mxu1 %v1094_v48 }
  0x68   :  { %302 = vmatpush1.bf16.msra.mxu0 %v1056_v23  ;;  %v1252_v23 = vmov 0  }
  0x69   :  { %303 = vmatprep.subr.bf16.mxu0 %v1057_v24  ;;  %1012 = vmatpush3.bf16.msra.mxu1 %v1095_v49 }
  0x6a   :  { %1013 = vmatprep.subr.bf16.mxu1 %v1096_v50 }
  0x6c   :  { %304 = vmatpush1.bf16.msra.mxu0 %v1059_v27 }
  0x6d   :  { %305 = vmatprep.subr.bf16.mxu0 %v1060_v28  ;;  %1014 = vmatpush3.bf16.msra.mxu1 %v1097_v51 }
  0x6e   :  { %615 = vmatprep.subr.bf16.mxu1 %v1100_v52 }
  0x70   :  { %306 = vmatpush1.bf16.msra.mxu0 %v1062_v29 }
  0x71   :  { %307 = vmatprep.subr.bf16.mxu0 %v1063_v32 }
  0x74   :  { %308 = vmatpush1.bf16.msra.mxu0 %v1065_v35  ;;  %v528_v35 = vrot.slane %v78_v33, %v119_v55 }
  0x75   :  { %309 = vmatprep.subr.bf16.mxu0 %v1066_v36 }
  0x78   :  { %310 = vmatpush1.bf16.msra.mxu0 %v1068_v38 }
  0x79   :  { %311 = vmatprep.subr.bf16.mxu0 %v1069_v39 }
  0x7c   :  { %312 = vmatpush1.bf16.msra.mxu0 %v1071_v40 }
  0x7d   :  { %313 = vmatprep.subr.bf16.mxu0 %v1072_v41 }
  0x80   :  { %314 = vmatpush1.bf16.msra.mxu0 %v1074_v42  ;;  %v1253_v42 = vmov 0.0  }
  0x81   :  { %315 = vmatprep.subr.bf16.mxu0 %v1075_v43  ;;  %895 = vst [vmem:[#allocation10] sm:$0xf0] %v1253_v42  ;;  %896 = vst [vmem:[#allocation10 + $0x8] sm:$0xf0] %v1253_v42 }
  0x84   :  { %316 = vmatpush1.bf16.msra.mxu0 %v1077_v44 }
  0x85   :  { %317 = vmatprep.subr.bf16.mxu0 %v1078_v45 }
  0x88   :  { %318 = vmatpush1.bf16.msra.mxu0 %v1080_v46 }
  0x8b   :  { %320 = vmatmul.mubr.bf16.vlgmr.msra.gmra.mrb[0].mxu0 %v82_v47 }
  0x8c   :  { %720 = vmatprep.mubr.f32.mxu0 %v1345_v16 }
 0x15e   :  { %v321_v60 = vpop.f32.mrb[0].mxu0 }
 0x15f   :  { %v322_v61 = vadd.f32 %v321_v60, %v120_v58  ;;  %v323_v62 = vpop.f32.mrb[1].mxu0 }
 0x160   :  { %v324_v63 = vadd.f32 %v323_v62, %v124_v59  ;;  %v325_v0 = vpop.f32.mrb[2].mxu0  ;;  %v861_v62 = vand.u32 127, %v117_v53 }
 0x161   :  { %v328_v1 = vmax.f32 %v322_v61, 0.0  ;;  %v326_v2 = vpop.f32.mrb[3].mxu0 }
 0x162   :  { %v329_v3 = vmax.f32 %v324_v63, 0.0  ;;  %vm862_vm2 = vcmp.eq.s32.totalorder %v1353_v54, %v861_v62 }
 0x163   :  { %v330_v6 = vpack.c.bf16 %v328_v1, %v328_v1  ;;  %v863_v0 = vsel %vm862_vm2, 0.001, %v1253_v42  ;;  %vm883_vm4 = vmxor %vm862_vm2, %vm1254_vm3 }
 0x164   :  { %v331_v4 = vpack.c.bf16 %v329_v3, %v329_v3 }
 0x166   :  { %498 = vmatprep.mubr.bf16.mxu1 %v331_v4 }
 0x167   :  { %499 = vmatmul.mubr.bf16.vlgmr.msra.gmra.mrb[0].mxu1 %v330_v6 }
 0x168   :  { %616 = vmatpush1.bf16.msra.mxu1 %v1098_v5  ;;  %647 = vmatprep.mubr.bf16.mxu1 %v1252_v23 }
 0x169   :  { %617 = vmatprep.subr.bf16.mxu1 %v1103_v7 }
 0x16c   :  { %618 = vmatpush1.bf16.msra.mxu1 %v1101_v8 }
 0x16d   :  { %619 = vmatprep.subr.bf16.mxu1 %v1106_v9 }
 0x170   :  { %620 = vmatpush1.bf16.msra.mxu1 %v1104_v10 }
 0x171   :  { %621 = vmatprep.subr.bf16.mxu1 %v1109_v11 }
 0x174   :  { %622 = vmatpush1.bf16.msra.mxu1 %v1107_v12 }
 0x175   :  { %623 = vmatprep.subr.bf16.mxu1 %v1112_v13 }
 0x178   :  { %624 = vmatpush1.bf16.msra.mxu1 %v1110_v15 }
 0x179   :  { %625 = vmatprep.subr.bf16.mxu1 %v1115_v17  ;;  %v873_v17 = vcvt.s32.f32 %v1353_v54 }
 0x17c   :  { %626 = vmatpush1.bf16.msra.mxu1 %v1113_v18 }
 0x17d   :  { %627 = vmatprep.subr.bf16.mxu1 %v1118_v19 }
 0x180   :  { %628 = vmatpush1.bf16.msra.mxu1 %v1116_v20 }
 0x181   :  { %629 = vmatprep.subr.bf16.mxu1 %v1121_v21 }
 0x184   :  { %630 = vmatpush1.bf16.msra.mxu1 %v1119_v22 }
 0x185   :  { %996 = vmatprep.subr.msk.mxu1 %vm782_vm0, %v1345_v16 }
 0x23a   :  { %v1015_v24 = vpop.f32.mrb[0].mxu1 }
 0x23b   :  { %v1016_v26 = vpop.f32.mrb[1].mxu1 }
 0x23c   :  { %v1017_v27 = vadd.f32 %v1016_v26, %v1015_v24  ;;  %v1018_v28 = vpop.f32.mrb[2].mxu1 }
 0x23d   :  { %v1019_v29 = vpop.f32.mrb[3].mxu1 }
 0x23e   :  { %v501_v30 = vadd.f32 %v1017_v27, %v963_v25 }
 0x240   :  { %v506_v31 = vmax.f32 %v501_v30, 0.0 }
 0x242   :  { %v507_v32 = vpack.c.bf16 %v506_v31, %v506_v31 }
 0x244   :  { %648 = vmatmul.mubr.bf16.vlgmr.msra.gmra.mrb[4].mxu1 %v507_v32 }
 0x245   :  { %851 = vmatprep.mubr.f32.mxu1 %v1253_v42  ;;  %997 = vmatpush1.msk.msra.mxu1 %vm782_vm0, %v1341_v14 }
 0x317   :  { %v649_v36 = vpop.f32.mrb[4].mxu1 }
 0x318   :  { %v651_v37 = vpop.f32.mrb[5].mxu1  ;;  %v650_v40 = vadd.f32 %v649_v36, %v528_v35 }
 0x319   :  { %v652_v38 = vadd.f32 %v651_v37, %v532_v34  ;;  %v653_v39 = vpop.f32.mrb[6].mxu1 }
 0x31a   :  { %v654_v41 = vpop.f32.mrb[7].mxu1 }
 0x31b   :  { %656 = vmatprep.subr.mxu0 %v652_v38 }
 0x31c   :  { %657 = vmatpush1.xpose.msra.mxu0 %v650_v40 }
 0x31f   :  { %721 = vmatmul.mubr.f32.vlgmr.msra.gmra.mrb[4].mxu0 %v1341_v14 }
 0x3f2   :  { %v722_v43 = vpop.f32.mrb[4].mxu0 }
 0x3f3   :  { %v727_v44 = vsel %vm726_vm1, %v722_v43, -inf  ;;  %v724_v45 = vpop.f32.mrb[5].mxu0 }
 0x3f4   :  { %v728_v46 = vrot.slane %v727_v44, 4 }
 0x3f6   :  { %v729_v47 = vmax.f32 %v727_v44, %v728_v46 }
 0x3f8   :  { %v730_v48 = vrot.slane %v729_v47, 2 }
 0x3fa   :  { %v731_v49 = vmax.f32 %v729_v47, %v730_v48 }
 0x3fc   :  { %v732_v50 = vrot.slane %v731_v49, 1 }
 0x3fe   :  { %v733_v51 = vmax.f32 %v731_v49, %v732_v50 }
 0x400   :  { %v734_v52 = vsub.f32 %v722_v43, %v733_v51 }
 0x402   :  { %v735_v55 = vmul.f32 1.442695, %v734_v52 }
 0x404   :  { %1122 = vpow2.f32 %v735_v55 }
 0x40e   :  { %v1123_v56 = vpop.eup %1122 }
 0x40f   :  { %v737_v57 = vsel %vm726_vm1, %v1123_v56, 0.0 }
 0x410   :  { %v738_v16 = vrot.slane %v737_v57, 4 }
 0x412   :  { %v739_v58 = vadd.f32 %v738_v16, %v737_v57 }
 0x414   :  { %v740_v14 = vrot.slane %v739_v58, 2 }
 0x416   :  { %v741_v59 = vadd.f32 %v740_v14, %v739_v58 }
 0x418   :  { %v742_v60 = vrot.slane %v741_v59, 1 }
 0x41a   :  { %v743_v61 = vadd.f32 %v742_v60, %v741_v59 }
 0x41c   :  { %1124 = vrcp.f32 %v743_v61 }
 0x426   :  { %v1125_v63 = vpop.eup %1124 }
 0x427   :  { %v745_v1 = vmul.f32 %v1125_v63, %v1123_v56 }
 0x429   :  { %746 = vxpose.xlu0.b32.start.end [1/1] (short) (narrow) %v745_v1, 8  ;;  %v864_v2 = vadd.f32 %v863_v0, %v745_v1 }
 0x42b   :  { %v865_v3 = vsel %vm726_vm1, %v864_v2, -inf  ;;  %v898_v4 = vrot.slane %v864_v2, 4  ;;  %vm882_vm6 = vcmp.gt.f32.partialorder %v864_v2, 0.25 }
 0x42c   :  { %v866_v5 = vrot.slane %v865_v3, 4  ;;  %vm884_vm7 = vmand %vm882_vm6, %vm883_vm4 }
 0x42d   :  { %v885_v6 = vsel %vm884_vm7, 1.0, %v1253_v42  ;;  %901 = vst.msk [vmem:[#allocation10] sm:$0xf0] %vm900_vm5, %v898_v4 }
 0x42e   :  { %v867_v7 = vmax.f32 %v865_v3, %v866_v5  ;;  %v886_v53 = vsel %vm726_vm1, %v885_v6, 0.0 }
 0x42f   :  { %v887_v8 = vrot.slane %v886_v53, 4 }
 0x430   :  { %v868_v9 = vrot.slane %v867_v7, 2 }
 0x431   :  { %v888_v10 = vadd.f32 %v887_v8, %v886_v53 }
 0x432   :  { %v869_v11 = vmax.f32 %v867_v7, %v868_v9 }
 0x433   :  { %v889_v12 = vrot.slane %v888_v10, 2 }
 0x434   :  { %v870_v13 = vrot.slane %v869_v11, 1 }
 0x435   :  { %v890_v15 = vadd.f32 %v889_v12, %v888_v10 }
 0x436   :  { %v871_v18 = vmax.f32 %v869_v11, %v870_v13 }
 0x437   :  { %v891_v19 = vrot.slane %v890_v15, 1 }
 0x438   :  { %vm872_vm8 = vcmp.eq.f32.partialorder %v864_v2, %v871_v18 }
 0x439   :  { %v892_v20 = vadd.f32 %v891_v19, %v890_v15  ;;  %v874_v21 = vsel %vm872_vm8, %v873_v17, 4.0 }
 0x43a   :  { %v875_v22 = vsel %vm726_vm1, %v874_v21, inf }
 0x43b   :  { %909 = vrot.lane.b32.xlu1 %v892_v20, %s1246_s29  ;;  %v876_v23 = vrot.slane %v875_v22, 4  ;;  %s1214_s29 = scalar_lea.vmem %s921_s22, 256 }
 0x43c   :  { %p1215_p4 = scmp.ne.s32.totalorder %s921_s22, %s1214_s29  ;;  %p1220_p6 = scmp.lt.s32.totalorder %s1214_s29, %s1214_s29 }
 0x43d   :  { %v877_v24 = vmin.f32 %v875_v22, %v876_v23 }
 0x43e   :  { %p1221_p7 = por %p1220_p6, %p1219_p5 }
 0x43f   :  { %v878_v25 = vrot.slane %v877_v24, 2 }
 0x440   :  { %p1222_p8 = pnand %p1221_p7, %p1215_p4 }
 0x441   :  { %v879_v26 = vmin.f32 %v877_v24, %v878_v25 }
 0x443   :  { %v880_v27 = vrot.slane %v879_v26, 1 }
 0x445   :  { %v881_v28 = vmin.f32 %v879_v26, %v880_v27 }
 0x452   :  { %903 = vrot.lane.b32.xlu0 %v881_v28, %s1250_s30 }
 0x4a9   :  { %v762_v29 = vpop.trf.xlu0 }
 0x4aa   :  { %998 = vmatmul.mubr.msk.f32.vlgmr.msra.gmra.mrb[8].mxu1 %vm778_vm9, %v762_v29 }
 0x4ad   :  { %v910_v30 = vpop.permute.xlu1 %909 }
 0x4c4   :  { %v904_v54 = vpop.permute.xlu0 %903 }
 0x4c5   :  { %907 = vst.msk [vmem:[#allocation10 + $0x4] sm:$0x1] %vm906_vm10, %v904_v54 }
 0x4c6   :  { %913 = vst.msk [vmem:[#allocation10 + $0x4] sm:$0x1] %vm912_vm11, %v910_v30 }
 0x57d   :  { %v853_v31 = vpop.f32.mrb[8].mxu1 }
 0x57e   :  { %893 = vst [vmem:[#allocation10] sm:$0xf] %v853_v31  ;;  %v855_v32 = vpop.f32.mrb[9].mxu1 }
 0x57f   :  { %894 = vst [vmem:[#allocation10 + $0x8] sm:$0xf] %v855_v32 }
 0x580   :  { %1225 = shalt.err (!%p1222_p8)
}
 0x581   :  { %s1226_s25 = scalar_lea.hbm %s1396_s5, 256 }
 0x582   :  { %p1227_p9 = scmp.ne.s32.totalorder %s1396_s5, %s1226_s25  ;;  %p1230_p10 = scmp.lt.u32.totalorder %s1226_s25, %s1396_s5 }
 0x584   :  { %p1232_p11 = pnand %p1230_p10, %p1227_p9 }
 0x586   :  { %1235 = shalt.err (!%p1232_p11)
}
 0x587   :  { %923 = dma.vmem_to_hbm [thread:$0]  %s921_s22, 256, %s1396_s5, [#allocation4]  }
 0x588   :  { %1242 = dma.done.wait [#allocation4], 256  }
 0x589   :  { %1243 = vsyncadd [#allocation4], 4294967040 }
 0x58a   :  { %927 = vsyncpa [#allocation3], 1 }
 0x58b   :  { %928 = vsyncpa [#allocation6], 1 }
 0x58c   :  { %929 = vsyncpa [#allocation9], 1 }
 0x58d   :  { %930 = vsyncpa [#allocation4], 1 }

</bundles_post_ra>
